<compile_context>
chip_gen: v5e
topology: v5e:2x2
jax: 0.10.0
libtpu: 0.0.40
codegen_flags: <defaults>
</compile_context>

<pallas_src>
import math

import jax
import jax.numpy as jnp
from jax.experimental import pallas as pl
from jax.experimental.pallas import tpu as pltpu

N_TERMS = 30
A_COEF = 0.75

LANES = 512            # lane-dense slab width (multiple of 128 -> unmasked stores)
MAX_BLOCK_ROWS = 512   # 512 x 512 f32 = 1 MiB/buffer; safe on v5e's 16 MiB scoped VMEM


def _weierstrass_kernel(x_ref, o_ref):
    """Elementwise hot path: 30-term cosine series via triple-angle recurrence."""
    x = x_ref[...]
    # c = cos(3^n * pi * x); start at n = 0, advance with cos(3t) = c*(4c^2 - 3).
    c = jnp.cos(math.pi * x)
    w = c                              # n = 0 term: coef = (-0.75)^0 = 1
    coef = 1.0
    for _ in range(1, N_TERMS):        # trace-time unroll (LLO scheduler visibility)
        coef *= -A_COEF
        c = c * (4.0 * c * c - 3.0)
        w = w + coef * c
    out = w * jnp.exp(-0.75 * jnp.abs(x)) + jnp.maximum(x, 0.0)
    o_ref[...] = out.astype(o_ref.dtype)


def _choose_block_rows(rows):
    """Pick a sublane-aligned block height; keep grid >= 2 when rows > 8."""
    if rows <= 8:
        return rows                    # single block equal to full array dims
    half = -(-rows // 2)               # ceil(rows / 2) -> at least 2 grid steps
    half_aligned = ((half + 7) // 8) * 8
    return min(MAX_BLOCK_ROWS, half_aligned)


@jax.jit
def modified_weierstrass(x):
    """x: any shape, float32 (NCHW in the reference). Returns float32, same shape."""
    orig_shape = x.shape
    total = x.size
    x = x.astype(jnp.float32)

    rows = -(-total // LANES)          # ceil
    padded = rows * LANES
    x_flat = jnp.reshape(x, (total,))
    if padded != total:                # skipped entirely when total % 512 == 0
        x_flat = jnp.pad(x_flat, (0, padded - total))
    x2d = jnp.reshape(x_flat, (rows, LANES))

    block_rows = _choose_block_rows(rows)
    grid = (pl.cdiv(rows, block_rows),)

    out2d = pl.pallas_call(
        _weierstrass_kernel,
        out_shape=jax.ShapeDtypeStruct((rows, LANES), jnp.float32),
        grid=grid,
        in_specs=[pl.BlockSpec((block_rows, LANES), lambda i: (i, 0))],
        out_specs=pl.BlockSpec((block_rows, LANES), lambda i: (i, 0)),
        compiler_params=pltpu.CompilerParams(
            dimension_semantics=("parallel",),
        ),
    )(x2d)

    out_flat = jnp.reshape(out2d, (padded,))
    if padded != total:
        out_flat = out_flat[:total]
    return jnp.reshape(out_flat, orig_shape)


if __name__ == "__main__":
    key = jax.random.PRNGKey(0)
    # Small NCHW input: batch=2, channels=4, 16x16 (2048 elems -> (4, 512) slab, no pad).
    x = jax.random.normal(key, (2, 4, 16, 16), dtype=jnp.float32)

    out = modified_weierstrass(x)
    out = jax.block_until_ready(out)

    assert out.shape == x.shape
    assert out.dtype == jnp.float32

    print("KERNEL_OK")
</pallas_src>

<mosaic_0001>
module attributes {stable_mosaic.version = 11 : i64} {
  func.func @_weierstrass_kernel(%arg0: i32, %arg1: memref<4x512xf32, #tpu.memory_space<vmem>>, %arg2: memref<4x512xf32, #tpu.memory_space<vmem>>) attributes {dimension_semantics = [#tpu.dimension_semantics<parallel>], iteration_bounds = array<i64: 1>, scalar_prefetch = 0 : i64, scratch_operands = 0 : i64, tpu.core_type = #tpu.core_type<tc>, window_params = [{transform_indices = @transform_0, window_bounds = array<i64: 4, 512>}, {transform_indices = @transform_1, window_bounds = array<i64: 4, 512>}]} {
    %c0 = arith.constant 0 : index
    %c0_0 = arith.constant 0 : index
    %0 = vector.load %arg1[%c0, %c0_0] : memref<4x512xf32, #tpu.memory_space<vmem>>, vector<4x512xf32>
    %cst = arith.constant 3.14159274 : f32
    %1 = vector.broadcast %cst : f32 to vector<4x512xf32>
    %2 = arith.mulf %1, %0 : vector<4x512xf32>
    %3 = math.cos %2 : vector<4x512xf32>
    %cst_1 = arith.constant 4.000000e+00 : f32
    %4 = vector.broadcast %cst_1 : f32 to vector<4x512xf32>
    %5 = arith.mulf %4, %3 : vector<4x512xf32>
    %6 = arith.mulf %5, %3 : vector<4x512xf32>
    %cst_2 = arith.constant 3.000000e+00 : f32
    %7 = vector.broadcast %cst_2 : f32 to vector<4x512xf32>
    %8 = arith.subf %6, %7 : vector<4x512xf32>
    %9 = arith.mulf %3, %8 : vector<4x512xf32>
    %cst_3 = arith.constant -7.500000e-01 : f32
    %10 = vector.broadcast %cst_3 : f32 to vector<4x512xf32>
    %11 = arith.mulf %10, %9 : vector<4x512xf32>
    %12 = arith.addf %3, %11 : vector<4x512xf32>
    %cst_4 = arith.constant 4.000000e+00 : f32
    %13 = vector.broadcast %cst_4 : f32 to vector<4x512xf32>
    %14 = arith.mulf %13, %9 : vector<4x512xf32>
    %15 = arith.mulf %14, %9 : vector<4x512xf32>
    %cst_5 = arith.constant 3.000000e+00 : f32
    %16 = vector.broadcast %cst_5 : f32 to vector<4x512xf32>
    %17 = arith.subf %15, %16 : vector<4x512xf32>
    %18 = arith.mulf %9, %17 : vector<4x512xf32>
    %cst_6 = arith.constant 5.625000e-01 : f32
    %19 = vector.broadcast %cst_6 : f32 to vector<4x512xf32>
    %20 = arith.mulf %19, %18 : vector<4x512xf32>
    %21 = arith.addf %12, %20 : vector<4x512xf32>
    %cst_7 = arith.constant 4.000000e+00 : f32
    %22 = vector.broadcast %cst_7 : f32 to vector<4x512xf32>
    %23 = arith.mulf %22, %18 : vector<4x512xf32>
    %24 = arith.mulf %23, %18 : vector<4x512xf32>
    %cst_8 = arith.constant 3.000000e+00 : f32
    %25 = vector.broadcast %cst_8 : f32 to vector<4x512xf32>
    %26 = arith.subf %24, %25 : vector<4x512xf32>
    %27 = arith.mulf %18, %26 : vector<4x512xf32>
    %cst_9 = arith.constant -4.218750e-01 : f32
    %28 = vector.broadcast %cst_9 : f32 to vector<4x512xf32>
    %29 = arith.mulf %28, %27 : vector<4x512xf32>
    %30 = arith.addf %21, %29 : vector<4x512xf32>
    %cst_10 = arith.constant 4.000000e+00 : f32
    %31 = vector.broadcast %cst_10 : f32 to vector<4x512xf32>
    %32 = arith.mulf %31, %27 : vector<4x512xf32>
    %33 = arith.mulf %32, %27 : vector<4x512xf32>
    %cst_11 = arith.constant 3.000000e+00 : f32
    %34 = vector.broadcast %cst_11 : f32 to vector<4x512xf32>
    %35 = arith.subf %33, %34 : vector<4x512xf32>
    %36 = arith.mulf %27, %35 : vector<4x512xf32>
    %cst_12 = arith.constant 0.31640625 : f32
    %37 = vector.broadcast %cst_12 : f32 to vector<4x512xf32>
    %38 = arith.mulf %37, %36 : vector<4x512xf32>
    %39 = arith.addf %30, %38 : vector<4x512xf32>
    %cst_13 = arith.constant 4.000000e+00 : f32
    %40 = vector.broadcast %cst_13 : f32 to vector<4x512xf32>
    %41 = arith.mulf %40, %36 : vector<4x512xf32>
    %42 = arith.mulf %41, %36 : vector<4x512xf32>
    %cst_14 = arith.constant 3.000000e+00 : f32
    %43 = vector.broadcast %cst_14 : f32 to vector<4x512xf32>
    %44 = arith.subf %42, %43 : vector<4x512xf32>
    %45 = arith.mulf %36, %44 : vector<4x512xf32>
    %cst_15 = arith.constant -0.237304688 : f32
    %46 = vector.broadcast %cst_15 : f32 to vector<4x512xf32>
    %47 = arith.mulf %46, %45 : vector<4x512xf32>
    %48 = arith.addf %39, %47 : vector<4x512xf32>
    %cst_16 = arith.constant 4.000000e+00 : f32
    %49 = vector.broadcast %cst_16 : f32 to vector<4x512xf32>
    %50 = arith.mulf %49, %45 : vector<4x512xf32>
    %51 = arith.mulf %50, %45 : vector<4x512xf32>
    %cst_17 = arith.constant 3.000000e+00 : f32
    %52 = vector.broadcast %cst_17 : f32 to vector<4x512xf32>
    %53 = arith.subf %51, %52 : vector<4x512xf32>
    %54 = arith.mulf %45, %53 : vector<4x512xf32>
    %cst_18 = arith.constant 0.177978516 : f32
    %55 = vector.broadcast %cst_18 : f32 to vector<4x512xf32>
    %56 = arith.mulf %55, %54 : vector<4x512xf32>
    %57 = arith.addf %48, %56 : vector<4x512xf32>
    %cst_19 = arith.constant 4.000000e+00 : f32
    %58 = vector.broadcast %cst_19 : f32 to vector<4x512xf32>
    %59 = arith.mulf %58, %54 : vector<4x512xf32>
    %60 = arith.mulf %59, %54 : vector<4x512xf32>
    %cst_20 = arith.constant 3.000000e+00 : f32
    %61 = vector.broadcast %cst_20 : f32 to vector<4x512xf32>
    %62 = arith.subf %60, %61 : vector<4x512xf32>
    %63 = arith.mulf %54, %62 : vector<4x512xf32>
    %cst_21 = arith.constant -0.133483887 : f32
    %64 = vector.broadcast %cst_21 : f32 to vector<4x512xf32>
    %65 = arith.mulf %64, %63 : vector<4x512xf32>
    %66 = arith.addf %57, %65 : vector<4x512xf32>
    %cst_22 = arith.constant 4.000000e+00 : f32
    %67 = vector.broadcast %cst_22 : f32 to vector<4x512xf32>
    %68 = arith.mulf %67, %63 : vector<4x512xf32>
    %69 = arith.mulf %68, %63 : vector<4x512xf32>
    %cst_23 = arith.constant 3.000000e+00 : f32
    %70 = vector.broadcast %cst_23 : f32 to vector<4x512xf32>
    %71 = arith.subf %69, %70 : vector<4x512xf32>
    %72 = arith.mulf %63, %71 : vector<4x512xf32>
    %cst_24 = arith.constant 0.100112915 : f32
    %73 = vector.broadcast %cst_24 : f32 to vector<4x512xf32>
    %74 = arith.mulf %73, %72 : vector<4x512xf32>
    %75 = arith.addf %66, %74 : vector<4x512xf32>
    %cst_25 = arith.constant 4.000000e+00 : f32
    %76 = vector.broadcast %cst_25 : f32 to vector<4x512xf32>
    %77 = arith.mulf %76, %72 : vector<4x512xf32>
    %78 = arith.mulf %77, %72 : vector<4x512xf32>
    %cst_26 = arith.constant 3.000000e+00 : f32
    %79 = vector.broadcast %cst_26 : f32 to vector<4x512xf32>
    %80 = arith.subf %78, %79 : vector<4x512xf32>
    %81 = arith.mulf %72, %80 : vector<4x512xf32>
    %cst_27 = arith.constant -0.0750846862 : f32
    %82 = vector.broadcast %cst_27 : f32 to vector<4x512xf32>
    %83 = arith.mulf %82, %81 : vector<4x512xf32>
    %84 = arith.addf %75, %83 : vector<4x512xf32>
    %cst_28 = arith.constant 4.000000e+00 : f32
    %85 = vector.broadcast %cst_28 : f32 to vector<4x512xf32>
    %86 = arith.mulf %85, %81 : vector<4x512xf32>
    %87 = arith.mulf %86, %81 : vector<4x512xf32>
    %cst_29 = arith.constant 3.000000e+00 : f32
    %88 = vector.broadcast %cst_29 : f32 to vector<4x512xf32>
    %89 = arith.subf %87, %88 : vector<4x512xf32>
    %90 = arith.mulf %81, %89 : vector<4x512xf32>
    %cst_30 = arith.constant 0.0563135147 : f32
    %91 = vector.broadcast %cst_30 : f32 to vector<4x512xf32>
    %92 = arith.mulf %91, %90 : vector<4x512xf32>
    %93 = arith.addf %84, %92 : vector<4x512xf32>
    %cst_31 = arith.constant 4.000000e+00 : f32
    %94 = vector.broadcast %cst_31 : f32 to vector<4x512xf32>
    %95 = arith.mulf %94, %90 : vector<4x512xf32>
    %96 = arith.mulf %95, %90 : vector<4x512xf32>
    %cst_32 = arith.constant 3.000000e+00 : f32
    %97 = vector.broadcast %cst_32 : f32 to vector<4x512xf32>
    %98 = arith.subf %96, %97 : vector<4x512xf32>
    %99 = arith.mulf %90, %98 : vector<4x512xf32>
    %cst_33 = arith.constant -0.042235136 : f32
    %100 = vector.broadcast %cst_33 : f32 to vector<4x512xf32>
    %101 = arith.mulf %100, %99 : vector<4x512xf32>
    %102 = arith.addf %93, %101 : vector<4x512xf32>
    %cst_34 = arith.constant 4.000000e+00 : f32
    %103 = vector.broadcast %cst_34 : f32 to vector<4x512xf32>
    %104 = arith.mulf %103, %99 : vector<4x512xf32>
    %105 = arith.mulf %104, %99 : vector<4x512xf32>
    %cst_35 = arith.constant 3.000000e+00 : f32
    %106 = vector.broadcast %cst_35 : f32 to vector<4x512xf32>
    %107 = arith.subf %105, %106 : vector<4x512xf32>
    %108 = arith.mulf %99, %107 : vector<4x512xf32>
    %cst_36 = arith.constant 0.031676352 : f32
    %109 = vector.broadcast %cst_36 : f32 to vector<4x512xf32>
    %110 = arith.mulf %109, %108 : vector<4x512xf32>
    %111 = arith.addf %102, %110 : vector<4x512xf32>
    %cst_37 = arith.constant 4.000000e+00 : f32
    %112 = vector.broadcast %cst_37 : f32 to vector<4x512xf32>
    %113 = arith.mulf %112, %108 : vector<4x512xf32>
    %114 = arith.mulf %113, %108 : vector<4x512xf32>
    %cst_38 = arith.constant 3.000000e+00 : f32
    %115 = vector.broadcast %cst_38 : f32 to vector<4x512xf32>
    %116 = arith.subf %114, %115 : vector<4x512xf32>
    %117 = arith.mulf %108, %116 : vector<4x512xf32>
    %cst_39 = arith.constant -0.023757264 : f32
    %118 = vector.broadcast %cst_39 : f32 to vector<4x512xf32>
    %119 = arith.mulf %118, %117 : vector<4x512xf32>
    %120 = arith.addf %111, %119 : vector<4x512xf32>
    %cst_40 = arith.constant 4.000000e+00 : f32
    %121 = vector.broadcast %cst_40 : f32 to vector<4x512xf32>
    %122 = arith.mulf %121, %117 : vector<4x512xf32>
    %123 = arith.mulf %122, %117 : vector<4x512xf32>
    %cst_41 = arith.constant 3.000000e+00 : f32
    %124 = vector.broadcast %cst_41 : f32 to vector<4x512xf32>
    %125 = arith.subf %123, %124 : vector<4x512xf32>
    %126 = arith.mulf %117, %125 : vector<4x512xf32>
    %cst_42 = arith.constant 0.017817948 : f32
    %127 = vector.broadcast %cst_42 : f32 to vector<4x512xf32>
    %128 = arith.mulf %127, %126 : vector<4x512xf32>
    %129 = arith.addf %120, %128 : vector<4x512xf32>
    %cst_43 = arith.constant 4.000000e+00 : f32
    %130 = vector.broadcast %cst_43 : f32 to vector<4x512xf32>
    %131 = arith.mulf %130, %126 : vector<4x512xf32>
    %132 = arith.mulf %131, %126 : vector<4x512xf32>
    %cst_44 = arith.constant 3.000000e+00 : f32
    %133 = vector.broadcast %cst_44 : f32 to vector<4x512xf32>
    %134 = arith.subf %132, %133 : vector<4x512xf32>
    %135 = arith.mulf %126, %134 : vector<4x512xf32>
    %cst_45 = arith.constant -0.013363461 : f32
    %136 = vector.broadcast %cst_45 : f32 to vector<4x512xf32>
    %137 = arith.mulf %136, %135 : vector<4x512xf32>
    %138 = arith.addf %129, %137 : vector<4x512xf32>
    %cst_46 = arith.constant 4.000000e+00 : f32
    %139 = vector.broadcast %cst_46 : f32 to vector<4x512xf32>
    %140 = arith.mulf %139, %135 : vector<4x512xf32>
    %141 = arith.mulf %140, %135 : vector<4x512xf32>
    %cst_47 = arith.constant 3.000000e+00 : f32
    %142 = vector.broadcast %cst_47 : f32 to vector<4x512xf32>
    %143 = arith.subf %141, %142 : vector<4x512xf32>
    %144 = arith.mulf %135, %143 : vector<4x512xf32>
    %cst_48 = arith.constant 0.0100225955 : f32
    %145 = vector.broadcast %cst_48 : f32 to vector<4x512xf32>
    %146 = arith.mulf %145, %144 : vector<4x512xf32>
    %147 = arith.addf %138, %146 : vector<4x512xf32>
    %cst_49 = arith.constant 4.000000e+00 : f32
    %148 = vector.broadcast %cst_49 : f32 to vector<4x512xf32>
    %149 = arith.mulf %148, %144 : vector<4x512xf32>
    %150 = arith.mulf %149, %144 : vector<4x512xf32>
    %cst_50 = arith.constant 3.000000e+00 : f32
    %151 = vector.broadcast %cst_50 : f32 to vector<4x512xf32>
    %152 = arith.subf %150, %151 : vector<4x512xf32>
    %153 = arith.mulf %144, %152 : vector<4x512xf32>
    %cst_51 = arith.constant -0.00751694664 : f32
    %154 = vector.broadcast %cst_51 : f32 to vector<4x512xf32>
    %155 = arith.mulf %154, %153 : vector<4x512xf32>
    %156 = arith.addf %147, %155 : vector<4x512xf32>
    %cst_52 = arith.constant 4.000000e+00 : f32
    %157 = vector.broadcast %cst_52 : f32 to vector<4x512xf32>
    %158 = arith.mulf %157, %153 : vector<4x512xf32>
    %159 = arith.mulf %158, %153 : vector<4x512xf32>
    %cst_53 = arith.constant 3.000000e+00 : f32
    %160 = vector.broadcast %cst_53 : f32 to vector<4x512xf32>
    %161 = arith.subf %159, %160 : vector<4x512xf32>
    %162 = arith.mulf %153, %161 : vector<4x512xf32>
    %cst_54 = arith.constant 5.637710e-03 : f32
    %163 = vector.broadcast %cst_54 : f32 to vector<4x512xf32>
    %164 = arith.mulf %163, %162 : vector<4x512xf32>
    %165 = arith.addf %156, %164 : vector<4x512xf32>
    %cst_55 = arith.constant 4.000000e+00 : f32
    %166 = vector.broadcast %cst_55 : f32 to vector<4x512xf32>
    %167 = arith.mulf %166, %162 : vector<4x512xf32>
    %168 = arith.mulf %167, %162 : vector<4x512xf32>
    %cst_56 = arith.constant 3.000000e+00 : f32
    %169 = vector.broadcast %cst_56 : f32 to vector<4x512xf32>
    %170 = arith.subf %168, %169 : vector<4x512xf32>
    %171 = arith.mulf %162, %170 : vector<4x512xf32>
    %cst_57 = arith.constant -0.00422828272 : f32
    %172 = vector.broadcast %cst_57 : f32 to vector<4x512xf32>
    %173 = arith.mulf %172, %171 : vector<4x512xf32>
    %174 = arith.addf %165, %173 : vector<4x512xf32>
    %cst_58 = arith.constant 4.000000e+00 : f32
    %175 = vector.broadcast %cst_58 : f32 to vector<4x512xf32>
    %176 = arith.mulf %175, %171 : vector<4x512xf32>
    %177 = arith.mulf %176, %171 : vector<4x512xf32>
    %cst_59 = arith.constant 3.000000e+00 : f32
    %178 = vector.broadcast %cst_59 : f32 to vector<4x512xf32>
    %179 = arith.subf %177, %178 : vector<4x512xf32>
    %180 = arith.mulf %171, %179 : vector<4x512xf32>
    %cst_60 = arith.constant 0.00317121204 : f32
    %181 = vector.broadcast %cst_60 : f32 to vector<4x512xf32>
    %182 = arith.mulf %181, %180 : vector<4x512xf32>
    %183 = arith.addf %174, %182 : vector<4x512xf32>
    %cst_61 = arith.constant 4.000000e+00 : f32
    %184 = vector.broadcast %cst_61 : f32 to vector<4x512xf32>
    %185 = arith.mulf %184, %180 : vector<4x512xf32>
    %186 = arith.mulf %185, %180 : vector<4x512xf32>
    %cst_62 = arith.constant 3.000000e+00 : f32
    %187 = vector.broadcast %cst_62 : f32 to vector<4x512xf32>
    %188 = arith.subf %186, %187 : vector<4x512xf32>
    %189 = arith.mulf %180, %188 : vector<4x512xf32>
    %cst_63 = arith.constant -0.00237840903 : f32
    %190 = vector.broadcast %cst_63 : f32 to vector<4x512xf32>
    %191 = arith.mulf %190, %189 : vector<4x512xf32>
    %192 = arith.addf %183, %191 : vector<4x512xf32>
    %cst_64 = arith.constant 4.000000e+00 : f32
    %193 = vector.broadcast %cst_64 : f32 to vector<4x512xf32>
    %194 = arith.mulf %193, %189 : vector<4x512xf32>
    %195 = arith.mulf %194, %189 : vector<4x512xf32>
    %cst_65 = arith.constant 3.000000e+00 : f32
    %196 = vector.broadcast %cst_65 : f32 to vector<4x512xf32>
    %197 = arith.subf %195, %196 : vector<4x512xf32>
    %198 = arith.mulf %189, %197 : vector<4x512xf32>
    %cst_66 = arith.constant 0.00178380671 : f32
    %199 = vector.broadcast %cst_66 : f32 to vector<4x512xf32>
    %200 = arith.mulf %199, %198 : vector<4x512xf32>
    %201 = arith.addf %192, %200 : vector<4x512xf32>
    %cst_67 = arith.constant 4.000000e+00 : f32
    %202 = vector.broadcast %cst_67 : f32 to vector<4x512xf32>
    %203 = arith.mulf %202, %198 : vector<4x512xf32>
    %204 = arith.mulf %203, %198 : vector<4x512xf32>
    %cst_68 = arith.constant 3.000000e+00 : f32
    %205 = vector.broadcast %cst_68 : f32 to vector<4x512xf32>
    %206 = arith.subf %204, %205 : vector<4x512xf32>
    %207 = arith.mulf %198, %206 : vector<4x512xf32>
    %cst_69 = arith.constant -0.00133785501 : f32
    %208 = vector.broadcast %cst_69 : f32 to vector<4x512xf32>
    %209 = arith.mulf %208, %207 : vector<4x512xf32>
    %210 = arith.addf %201, %209 : vector<4x512xf32>
    %cst_70 = arith.constant 4.000000e+00 : f32
    %211 = vector.broadcast %cst_70 : f32 to vector<4x512xf32>
    %212 = arith.mulf %211, %207 : vector<4x512xf32>
    %213 = arith.mulf %212, %207 : vector<4x512xf32>
    %cst_71 = arith.constant 3.000000e+00 : f32
    %214 = vector.broadcast %cst_71 : f32 to vector<4x512xf32>
    %215 = arith.subf %213, %214 : vector<4x512xf32>
    %216 = arith.mulf %207, %215 : vector<4x512xf32>
    %cst_72 = arith.constant 0.00100339123 : f32
    %217 = vector.broadcast %cst_72 : f32 to vector<4x512xf32>
    %218 = arith.mulf %217, %216 : vector<4x512xf32>
    %219 = arith.addf %210, %218 : vector<4x512xf32>
    %cst_73 = arith.constant 4.000000e+00 : f32
    %220 = vector.broadcast %cst_73 : f32 to vector<4x512xf32>
    %221 = arith.mulf %220, %216 : vector<4x512xf32>
    %222 = arith.mulf %221, %216 : vector<4x512xf32>
    %cst_74 = arith.constant 3.000000e+00 : f32
    %223 = vector.broadcast %cst_74 : f32 to vector<4x512xf32>
    %224 = arith.subf %222, %223 : vector<4x512xf32>
    %225 = arith.mulf %216, %224 : vector<4x512xf32>
    %cst_75 = arith.constant -7.52543448E-4 : f32
    %226 = vector.broadcast %cst_75 : f32 to vector<4x512xf32>
    %227 = arith.mulf %226, %225 : vector<4x512xf32>
    %228 = arith.addf %219, %227 : vector<4x512xf32>
    %cst_76 = arith.constant 4.000000e+00 : f32
    %229 = vector.broadcast %cst_76 : f32 to vector<4x512xf32>
    %230 = arith.mulf %229, %225 : vector<4x512xf32>
    %231 = arith.mulf %230, %225 : vector<4x512xf32>
    %cst_77 = arith.constant 3.000000e+00 : f32
    %232 = vector.broadcast %cst_77 : f32 to vector<4x512xf32>
    %233 = arith.subf %231, %232 : vector<4x512xf32>
    %234 = arith.mulf %225, %233 : vector<4x512xf32>
    %cst_78 = arith.constant 5.64407615E-4 : f32
    %235 = vector.broadcast %cst_78 : f32 to vector<4x512xf32>
    %236 = arith.mulf %235, %234 : vector<4x512xf32>
    %237 = arith.addf %228, %236 : vector<4x512xf32>
    %cst_79 = arith.constant 4.000000e+00 : f32
    %238 = vector.broadcast %cst_79 : f32 to vector<4x512xf32>
    %239 = arith.mulf %238, %234 : vector<4x512xf32>
    %240 = arith.mulf %239, %234 : vector<4x512xf32>
    %cst_80 = arith.constant 3.000000e+00 : f32
    %241 = vector.broadcast %cst_80 : f32 to vector<4x512xf32>
    %242 = arith.subf %240, %241 : vector<4x512xf32>
    %243 = arith.mulf %234, %242 : vector<4x512xf32>
    %cst_81 = arith.constant -4.23305697E-4 : f32
    %244 = vector.broadcast %cst_81 : f32 to vector<4x512xf32>
    %245 = arith.mulf %244, %243 : vector<4x512xf32>
    %246 = arith.addf %237, %245 : vector<4x512xf32>
    %cst_82 = arith.constant 4.000000e+00 : f32
    %247 = vector.broadcast %cst_82 : f32 to vector<4x512xf32>
    %248 = arith.mulf %247, %243 : vector<4x512xf32>
    %249 = arith.mulf %248, %243 : vector<4x512xf32>
    %cst_83 = arith.constant 3.000000e+00 : f32
    %250 = vector.broadcast %cst_83 : f32 to vector<4x512xf32>
    %251 = arith.subf %249, %250 : vector<4x512xf32>
    %252 = arith.mulf %243, %251 : vector<4x512xf32>
    %cst_84 = arith.constant 3.1747928E-4 : f32
    %253 = vector.broadcast %cst_84 : f32 to vector<4x512xf32>
    %254 = arith.mulf %253, %252 : vector<4x512xf32>
    %255 = arith.addf %246, %254 : vector<4x512xf32>
    %cst_85 = arith.constant 4.000000e+00 : f32
    %256 = vector.broadcast %cst_85 : f32 to vector<4x512xf32>
    %257 = arith.mulf %256, %252 : vector<4x512xf32>
    %258 = arith.mulf %257, %252 : vector<4x512xf32>
    %cst_86 = arith.constant 3.000000e+00 : f32
    %259 = vector.broadcast %cst_86 : f32 to vector<4x512xf32>
    %260 = arith.subf %258, %259 : vector<4x512xf32>
    %261 = arith.mulf %252, %260 : vector<4x512xf32>
    %cst_87 = arith.constant -2.38109453E-4 : f32
    %262 = vector.broadcast %cst_87 : f32 to vector<4x512xf32>
    %263 = arith.mulf %262, %261 : vector<4x512xf32>
    %264 = arith.addf %255, %263 : vector<4x512xf32>
    %265 = math.absf %0 : vector<4x512xf32>
    %cst_88 = arith.constant -7.500000e-01 : f32
    %266 = vector.broadcast %cst_88 : f32 to vector<4x512xf32>
    %267 = arith.mulf %266, %265 : vector<4x512xf32>
    %268 = math.exp %267 : vector<4x512xf32>
    %269 = arith.mulf %264, %268 : vector<4x512xf32>
    %cst_89 = arith.constant 0.000000e+00 : f32
    %270 = vector.broadcast %cst_89 : f32 to vector<4x512xf32>
    %271 = arith.maximumf %0, %270 : vector<4x512xf32>
    %272 = arith.addf %269, %271 : vector<4x512xf32>
    %c0_90 = arith.constant 0 : index
    %c0_91 = arith.constant 0 : index
    %273 = vector.load %arg2[%c0_90, %c0_91] : memref<4x512xf32, #tpu.memory_space<vmem>>, vector<4x512xf32>
    tpu.vector_store %arg2[%c0_90, %c0_91], %272 {strides = array<i32>} : memref<4x512xf32, #tpu.memory_space<vmem>>, vector<4x512xf32>,
    return
  }
  func.func @transform_0(%arg0: i32) -> (i32, i32) {
    %c0_i32 = arith.constant 0 : i32
    %c0_i32_0 = arith.constant 0 : i32
    return %arg0, %c0_i32 : i32, i32
  }
  func.func @transform_1(%arg0: i32) -> (i32, i32) {
    %c0_i32 = arith.constant 0 : i32
    %c0_i32_0 = arith.constant 0 : i32
    return %arg0, %c0_i32 : i32, i32
  }
}

</mosaic_0001>

<bundles_post_ra>
// kernel: modified_weierstrass.1
= control target key start
LH: loop header
LB: loop body
LE: loop exit
PB: predicated region body
PF: predicated region fallthrough
CT: control target
= control target key end

     0   :  { %v765_v25 = vmov 683565275   ;;  %v766_v27 = vmov 2475754826   ;;  %v767_v29 = vmov 2131351028   ;;  %s981_s0 = inlined_call_operand.vmem [shape: f32[4,512], index: 0, kind: input, shape index: {}]   ;;  %s982_s1 = inlined_call_operand.vmem [shape: f32[4,512], index: 1, kind: output, shape index: {}]  }
   0x1   :  { %v8_v0 = vld [vmem:[%s981_s0] sm:$0xff]  ;;  %v9_v1 = vld [vmem:[%s981_s0 + $0x8] sm:$0xff]  ;;  %v768_v31 = vmov 2102212464   ;;  %v769_v33 = vmov 920167782  }
   0x2   :  { %v788_v2 = vmul.f32 3.1415927, %v8_v0  ;;  %v790_v3 = vmul.f32 3.1415927, %v9_v1  ;;  %v770_v42 = vmov 1326507024  }
   0x4   :  { %v12_v4 = vand.u32 2147483647, %v788_v2  ;;  %v15_v5 = vand.u32 2139095040, %v788_v2  ;;  %v166_v6 = vand.u32 2147483647, %v790_v3  ;;  %v169_v7 = vand.u32 2139095040, %v790_v3 }
   0x6   :  { %v16_v8 = vshrl.u32 %v15_v5, 23  ;;  %v19_v9 = vand.u32 8388607, %v12_v4  ;;  %v170_v10 = vshrl.u32 %v169_v7, 23  ;;  %v173_v14 = vand.u32 8388607, %v166_v6 }
   0x8   :  { %v688_v11 = vadd.s32 4294967169, %v16_v8  ;;  %v20_v12 = vor.u32 8388608, %v19_v9  ;;  %v691_v13 = vadd.s32 4294967169, %v170_v10  ;;  %v174_v19 = vor.u32 8388608, %v173_v14 }
   0xa   :  { %v22_v15 = vadd.s32 1, %v688_v11  ;;  %v176_v16 = vadd.s32 1, %v691_v13  ;;  %v800_v18 = vshll.u32 %v20_v12, 8  ;;  %v810_v36 = vshll.u32 %v174_v19, 8 }
   0xc   :  { %vm23_vm0 = vcmp.gt.s32.totalorder %v22_v15, 0  ;;  %vm177_vm1 = vcmp.gt.s32.totalorder %v176_v16, 0  ;;  %v61_v35 = vand.u32 65535, %v800_v18  ;;  %v62_v40 = vshrl.u32 %v800_v18, 16 }
   0xd   :  { %v24_v17 = vsel %vm23_vm0, %v22_v15, 0  ;;  %v178_v21 = vsel %vm177_vm1, %v176_v16, 0 }
   0xe   :  { %v26_v20 = vand.u32 31, %v24_v17  ;;  %v802_v22 = vshrl.u32 %v24_v17, 5  ;;  %v804_v23 = vand.u32 31, %v178_v21  ;;  %v828_v53 = vshrl.u32 %v178_v21, 5 }
  0x10   :  { %v27_v24 = vsub.s32 32, %v26_v20  ;;  %v29_v26 = vshll.u32 %v765_v25, %v26_v20  ;;  %v32_v28 = vshll.u32 %v766_v27, %v26_v20  ;;  %v35_v30 = vshll.u32 %v767_v29, %v26_v20 }
  0x11   :  { %v38_v32 = vshll.u32 %v768_v31, %v26_v20  ;;  %v41_v34 = vshll.u32 %v769_v33, %v26_v20  ;;  %vm44_vm2 = vcmp.lt.s32.totalorder %v802_v22, 1  ;;  %vm47_vm3 = vcmp.lt.s32.totalorder %v802_v22, 4 }
  0x12   :  { %v30_v37 = vshrl.u32 %v766_v27, %v27_v24  ;;  %v33_v38 = vshrl.u32 %v767_v29, %v27_v24  ;;  %v36_v39 = vshrl.u32 %v768_v31, %v27_v24  ;;  %v39_v41 = vshrl.u32 %v769_v33, %v27_v24 }
  0x13   :  { %v42_v43 = vshrl.u32 %v770_v42, %v27_v24  ;;  %v819_v47 = vsub.s32 32, %v804_v23  ;;  %v28_v48 = vshrl.u32 %v765_v25, %v27_v24  ;;  %vm46_vm4 = vcmp.lt.s32.totalorder %v802_v22, 3 }
  0x14   :  { %v31_v44 = vor.u32 %v30_v37, %v29_v26  ;;  %v34_v45 = vor.u32 %v33_v38, %v32_v28  ;;  %v37_v46 = vor.u32 %v36_v39, %v35_v30  ;;  %v40_v49 = vor.u32 %v39_v41, %v38_v32 }
  0x15   :  { %v43_v50 = vor.u32 %v42_v43, %v41_v34  ;;  %vm45_vm5 = vcmp.lt.s32.totalorder %v802_v22, 2  ;;  %v183_v56 = vshll.u32 %v765_v25, %v804_v23  ;;  %v186_v57 = vshll.u32 %v766_v27, %v804_v23 }
  0x16   :  { %v52_v51 = vsel %vm44_vm2, %v31_v44, %v34_v45  ;;  %v56_v52 = vsel %vm44_vm2, %v34_v45, %v37_v46  ;;  %v53_v54 = vsel %vm47_vm3, %v40_v49, 920167782  ;;  %v49_v58 = vsel %vm47_vm3, %v37_v46, 2102212464 }
  0x17   :  { %v57_v55 = vsel %vm47_vm3, %v43_v50, 1326507024  ;;  %v54_v59 = vsel %vm46_vm4, %v37_v46, %v53_v54  ;;  %v184_v61 = vshrl.u32 %v766_v27, %v819_v47  ;;  %v48_v62 = vsel %vm44_vm2, %v28_v48, %v31_v44 }
  0x18   :  { %v58_v60 = vsel %vm46_vm4, %v40_v49, %v57_v55  ;;  %v55_v63 = vsel %vm45_vm5, %v52_v51, %v54_v59  ;;  %v187_v1 = vshrl.u32 %v767_v29, %v819_v47  ;;  %v50_v10 = vsel %vm46_vm4, %v34_v45, %v49_v58 }
  0x19   :  { %v59_v0 = vsel %vm45_vm5, %v56_v52, %v58_v60  ;;  %v85_v8 = vand.u32 65535, %v55_v63  ;;  %v86_v9 = vshrl.u32 %v55_v63, 16  ;;  %v853_v11 = vor.u32 %v184_v61, %v183_v56 }
  0x1a   :  { %v63_v5 = vand.u32 65535, %v59_v0  ;;  %v64_v7 = vshrl.u32 %v59_v0, 16  ;;  %v855_v12 = vor.u32 %v187_v1, %v186_v57  ;;  %v189_v13 = vshll.u32 %v767_v29, %v804_v23 }
  0x1b   :  { %v190_v17 = vshrl.u32 %v768_v31, %v819_v47  ;;  %v87_v20 = vmul.u32 %v85_v8, %v61_v35  ;;  %v88_v21 = vmul.u32 %v86_v9, %v61_v35  ;;  %v89_v24 = vmul.u32 %v85_v8, %v62_v40 }
  0x1c   :  { %v65_v14 = vmul.u32 %v63_v5, %v61_v35  ;;  %v66_v15 = vmul.u32 %v64_v7, %v61_v35  ;;  %v67_v16 = vmul.u32 %v63_v5, %v62_v40  ;;  %v68_v19 = vmul.u32 %v64_v7, %v62_v40 }
  0x1d   :  { %v90_v30 = vmul.u32 %v86_v9, %v62_v40  ;;  %v91_v34 = vshll.u32 %v88_v21, 16  ;;  %v92_v37 = vshrl.u32 %v88_v21, 16  ;;  %v93_v38 = vshll.u32 %v89_v24, 16 }
  0x1e   :  { %v69_v26 = vshll.u32 %v66_v15, 16  ;;  %v70_v27 = vshrl.u32 %v66_v15, 16  ;;  %v71_v28 = vshll.u32 %v67_v16, 16  ;;  %v72_v32 = vshrl.u32 %v67_v16, 16 }
  0x1f   :  { %v94_v39 = vshrl.u32 %v89_v24, 16  ;;  %v192_v41 = vshll.u32 %v768_v31, %v804_v23  ;;  %v771_v43 = vmov 0   ;;  %vm95_vm7 = vc.u32 %v87_v20, %v91_v34 }
  0x20   :  { %vm73_vm6 = vc.u32 %v65_v14, %v69_v26  ;;  %v75_v29 = vadd.s32 %v69_v26, %v65_v14  ;;  %v97_v35 = vadd.s32 %v91_v34, %v87_v20  ;;  %v193_v45 = vshrl.u32 %v769_v33, %v819_v47 }
  0x21   :  { %v74_v44 = vsel %vm73_vm6, 1, %v771_v43  ;;  %v96_v40 = vsel %vm95_vm7, 1, %v771_v43  ;;  %v195_v48 = vshll.u32 %v769_v33, %v804_v23  ;;  %v191_v31 = vor.u32 %v190_v17, %v189_v13 }
  0x22   :  { %v76_v46 = vadd.s32 %v74_v44, %v68_v19  ;;  %vm77_vm8 = vc.u32 %v75_v29, %v71_v28  ;;  %v98_v50 = vadd.s32 %v96_v40, %v90_v30  ;;  %vm99_vm9 = vc.u32 %v97_v35, %v93_v38 }
  0x23   :  { %v78_v49 = vsel %vm77_vm8, 1, %v771_v43  ;;  %v100_v52 = vsel %vm99_vm9, 1, %v771_v43  ;;  %v194_v54 = vor.u32 %v193_v45, %v192_v41  ;;  %v196_v55 = vshrl.u32 %v770_v42, %v819_v47 }
  0x24   :  { %v80_v51 = vadd.s32 %v78_v49, %v76_v46  ;;  %v872_v56 = vadd.s32 %v97_v35, %v93_v38  ;;  %v102_v57 = vadd.s32 %v100_v52, %v98_v50  ;;  %vm198_vm10 = vcmp.lt.s32.totalorder %v828_v53, 1 }
  0x25   :  { %vm200_vm11 = vcmp.lt.s32.totalorder %v828_v53, 3  ;;  %v197_v33 = vor.u32 %v196_v55, %v195_v48  ;;  %vm199_vm12 = vcmp.lt.s32.totalorder %v828_v53, 2  ;;  %vm201_vm13 = vcmp.lt.s32.totalorder %v828_v53, 4 }
  0x26   :  { %v81_v23 = vadd.s32 %v80_v51, %v70_v27  ;;  %v51_v58 = vsel %vm45_vm5, %v48_v62, %v50_v10  ;;  %v103_v59 = vadd.s32 %v102_v57, %v92_v37  ;;  %v206_v42 = vsel %vm198_vm10, %v853_v11, %v855_v12 }
  0x27   :  { %v207_v60 = vsel %vm201_vm13, %v194_v54, 920167782  ;;  %v210_v0 = vsel %vm198_vm10, %v855_v12, %v191_v31  ;;  %v215_v22 = vand.u32 65535, %v810_v36  ;;  %v211_v5 = vsel %vm201_vm13, %v197_v33, 1326507024 }
  0x28   :  { %v886_v61 = vadd.s32 %v81_v23, %v72_v32  ;;  %v208_v63 = vsel %vm200_vm11, %v191_v31, %v207_v60  ;;  %v104_v62 = vadd.s32 %v103_v59, %v94_v39  ;;  %v216_v7 = vshrl.u32 %v810_v36, 16 }
  0x29   :  { %v209_v1 = vsel %vm199_vm12, %v206_v42, %v208_v63  ;;  %v105_v8 = vmul.u32 %v800_v18, %v51_v58  ;;  %v212_v9 = vsel %vm200_vm11, %v194_v54, %v211_v5  ;;  %v182_v20 = vshrl.u32 %v765_v25, %v819_v47 }
  0x2a   :  { %vm107_vm14 = vc.u32 %v886_v61, %v872_v56  ;;  %v239_v10 = vand.u32 65535, %v209_v1  ;;  %v108_v13 = vadd.s32 1, %v104_v62  ;;  %v213_v14 = vsel %vm199_vm12, %v210_v0, %v212_v9 }
  0x2b   :  { %v240_v15 = vshrl.u32 %v209_v1, 16  ;;  %v217_v16 = vand.u32 65535, %v213_v14  ;;  %v218_v17 = vshrl.u32 %v213_v14, 16  ;;  %v203_v37 = vsel %vm201_vm13, %v191_v31, 2102212464 }
  0x2c   :  { %v109_v19 = vsel %vm107_vm14, %v108_v13, %v104_v62  ;;  %v243_v18 = vmul.u32 %v239_v10, %v216_v7  ;;  %v241_v28 = vmul.u32 %v239_v10, %v215_v22  ;;  %v202_v39 = vsel %vm198_vm10, %v182_v20, %v853_v11 }
  0x2d   :  { %v242_v21 = vmul.u32 %v240_v15, %v215_v22  ;;  %v110_v24 = vadd.s32 %v109_v19, %v105_v8  ;;  %v219_v26 = vmul.u32 %v217_v16, %v215_v22  ;;  %v220_v27 = vmul.u32 %v218_v17, %v215_v22 }
  0x2e   :  { %v221_v30 = vmul.u32 %v217_v16, %v216_v7  ;;  %v222_v38 = vmul.u32 %v218_v17, %v216_v7  ;;  %v244_v25 = vmul.u32 %v240_v15, %v216_v7  ;;  %v247_v47 = vshll.u32 %v243_v18, 16 }
  0x2f   :  { %v245_v32 = vshll.u32 %v242_v21, 16  ;;  %v111_v34 = vadd.s32 536870912, %v110_v24  ;;  %v223_v29 = vshll.u32 %v220_v27, 16  ;;  %v204_v45 = vsel %vm200_vm11, %v855_v12, %v203_v37 }
  0x30   :  { %v225_v41 = vshll.u32 %v221_v30, 16  ;;  %v224_v11 = vshrl.u32 %v220_v27, 16  ;;  %v246_v51 = vshrl.u32 %v242_v21, 16  ;;  %v226_v55 = vshrl.u32 %v221_v30, 16 }
  0x31   :  { %v913_v44 = vshrl.u32 %v111_v34, 30  ;;  %vm227_vm15 = vc.u32 %v219_v26, %v223_v29  ;;  %v229_v35 = vadd.s32 %v223_v29, %v219_v26  ;;  %vm249_vm0 = vc.u32 %v241_v28, %v245_v32 }
  0x32   :  { %v228_v46 = vsel %vm227_vm15, 1, %v771_v43  ;;  %v250_v40 = vsel %vm249_vm0, 1, %v771_v43  ;;  %v251_v48 = vadd.s32 %v245_v32, %v241_v28  ;;  %v248_v23 = vshrl.u32 %v243_v18, 16 }
  0x33   :  { %v113_v49 = vshll.u32 %v913_v44, 30  ;;  %v230_v50 = vadd.s32 %v228_v46, %v222_v38  ;;  %vm231_vm1 = vc.u32 %v229_v35, %v225_v41  ;;  %v252_v52 = vadd.s32 %v250_v40, %v244_v25 }
  0x34   :  { %v232_v31 = vsel %vm231_vm1, 1, %v771_v43  ;;  %vm253_vm2 = vc.u32 %v251_v48, %v247_v47  ;;  %v255_v42 = vadd.s32 %v251_v48, %v247_v47  ;;  %v205_v60 = vsel %vm199_vm12, %v202_v39, %v204_v45 }
  0x35   :  { %v114_v54 = vsub.s32 %v110_v24, %v113_v49  ;;  %v234_v57 = vadd.s32 %v232_v31, %v230_v50  ;;  %v254_v12 = vsel %vm253_vm2, 1, %v771_v43  ;;  %v259_v5 = vmul.u32 %v810_v36, %v205_v60 }
  0x36   :  { %v256_v33 = vadd.s32 %v254_v12, %v252_v52  ;;  %v106_v43 = vadd.s32 %v872_v56, %v886_v61  ;;  %vm14_vm7 = vcmp.lt.s32.totalorder %v788_v2, 0  ;;  %vm934_vm8 = vcmp.le.f32.partialorder %v12_v4, 0.7853982 }
  0x37   :  { %vm115_vm3 = vcmp.lt.s32.totalorder %v114_v54, 0  ;;  %v116_v58 = vsub.s32 0, %v114_v54  ;;  %v235_v59 = vadd.s32 %v234_v57, %v224_v11  ;;  %v136_v39 = vsub.s32 4, %v913_v44 }
  0x38   :  { %v257_v63 = vadd.s32 %v256_v33, %v246_v51  ;;  %vm168_vm11 = vcmp.lt.s32.totalorder %v790_v3, 0  ;;  %vm952_vm13 = vcmp.le.f32.partialorder %v166_v6, 0.7853982  ;;  %vm155_vm15 = vweird.f32 %v788_v2 }
  0x39   :  { %v117_v0 = vsel %vm115_vm3, %v116_v58, %v114_v54  ;;  %v236_v22 = vadd.s32 %v235_v59, %v226_v55  ;;  %v137_v48 = vsel %vm14_vm7, %v136_v39, %v913_v44  ;;  %vm309_vm3 = vweird.f32 %v790_v3 }
  0x3a   :  { %v118_v62 = vclz %v117_v0  ;;  %v258_v1 = vadd.s32 %v257_v63, %v248_v23  ;;  %v139_v52 = vsel %vm934_vm8, 0, %v137_v48 }
  0x3b   :  { %vm261_vm4 = vc.u32 %v236_v22, %v255_v42  ;;  %v260_v47 = vadd.s32 %v255_v42, %v236_v22  ;;  %v156_v58 = vand.u32 3, %v139_v52 }
  0x3c   :  { %v689_v7 = vadd.s32 4294967294, %v118_v62  ;;  %v262_v8 = vadd.s32 1, %v258_v1 }
  0x3d   :  { %vm161_vm10 = vcmp.eq.s32.totalorder %v156_v58, 2  ;;  %vm158_vm12 = vcmp.eq.s32.totalorder %v156_v58, 0  ;;  %vm157_vm14 = vcmp.lt.s32.totalorder %v156_v58, 2 }
  0x3e   :  { %vm690_vm5 = vcmp.lt.s32.totalorder %v689_v7, 0  ;;  %v263_v9 = vsel %vm261_vm4, %v262_v8, %v258_v1 }
  0x3f   :  { %v121_v10 = vsel %vm690_vm5, 0, %v689_v7  ;;  %v264_v13 = vadd.s32 %v263_v9, %v259_v5 }
  0x40   :  { %v122_v14 = vsub.s32 32, %v121_v10  ;;  %v123_v53 = vshll.u32 %v114_v54, %v121_v10  ;;  %v126_v15 = vsub.s32 4294967266, %v121_v10 }
  0x41   :  { %v265_v16 = vadd.s32 536870912, %v264_v13 }
  0x42   :  { %v124_v17 = vshrl.u32 %v106_v43, %v122_v14  ;;  %v127_v19 = vadd.s32 127, %v126_v15 }
  0x43   :  { %v928_v20 = vshrl.u32 %v265_v16, 30 }
  0x44   :  { %v125_v21 = vor.u32 %v124_v17, %v123_v53  ;;  %v128_v36 = vshll.u32 %v127_v19, 23 }
  0x45   :  { %v267_v18 = vshll.u32 %v928_v20, 30  ;;  %v290_v14 = vsub.s32 4, %v928_v20 }
  0x46   :  { %v129_v24 = vor.u32 4788187, %v128_v36  ;;  %v132_v26 = vcvt.s32.f32 %v125_v21 }
  0x47   :  { %v268_v27 = vsub.s32 %v264_v13, %v267_v18 }
  0x48   :  { %v130_v56 = vand.u32 2147483647, %v129_v24 }
  0x49   :  { %vm269_vm6 = vcmp.lt.s32.totalorder %v268_v27, 0  ;;  %v270_v61 = vsub.s32 0, %v268_v27 }
  0x4a   :  { %v133_v28 = vmul.f32 %v132_v26, %v130_v56 }
  0x4b   :  { %v271_v30 = vsel %vm269_vm6, %v270_v61, %v268_v27 }
  0x4c   :  { %v134_v34 = vxor.u32 2147483648, %v133_v28  ;;  %v272_v37 = vclz %v271_v30 }
  0x4e   :  { %v135_v38 = vsel %vm14_vm7, %v134_v34, %v133_v28  ;;  %v692_v29 = vadd.s32 4294967294, %v272_v37 }
  0x4f   :  { %v138_v41 = vsel %vm934_vm8, %v788_v2, %v135_v38  ;;  %v291_v2 = vsel %vm168_vm11, %v290_v14, %v928_v20 }
  0x50   :  { %v140_v25 = vmul.f32 %v138_v41, %v138_v41  ;;  %vm693_vm9 = vcmp.lt.s32.totalorder %v692_v29, 0  ;;  %v293_v26 = vsel %vm952_vm13, 0, %v291_v2 }
  0x51   :  { %v275_v35 = vsel %vm693_vm9, 0, %v692_v29  ;;  %v310_v34 = vand.u32 3, %v293_v26 }
  0x52   :  { %v141_v4 = vmul.f32 -0.001358992, %v140_v25  ;;  %v148_v45 = vmul.f32 -0.00019511016, %v140_v25  ;;  %v276_v46 = vsub.s32 32, %v275_v35  ;;  %v277_v40 = vshll.u32 %v268_v27, %v275_v35 }
  0x53   :  { %v280_v49 = vsub.s32 4294967266, %v275_v35  ;;  %vm315_vm0 = vcmp.eq.s32.totalorder %v310_v34, 2  ;;  %vm312_vm1 = vcmp.eq.s32.totalorder %v310_v34, 0  ;;  %vm311_vm2 = vcmp.lt.s32.totalorder %v310_v34, 2 }
  0x54   :  { %v142_v11 = vadd.f32 0.041655596, %v141_v4  ;;  %v149_v50 = vadd.f32 0.008332121, %v148_v45  ;;  %v278_v31 = vshrl.u32 %v260_v47, %v276_v46 }
  0x55   :  { %v281_v51 = vadd.s32 127, %v280_v49 }
  0x56   :  { %v143_v54 = vmul.f32 %v142_v11, %v140_v25  ;;  %v150_v55 = vmul.f32 %v149_v50, %v140_v25  ;;  %v279_v57 = vor.u32 %v278_v31, %v277_v40 }
  0x57   :  { %v282_v12 = vshll.u32 %v281_v51, 23 }
  0x58   :  { %v144_v23 = vadd.f32 -0.4999988, %v143_v54  ;;  %v151_v33 = vadd.f32 -0.16666654, %v150_v55  ;;  %v286_v42 = vcvt.s32.f32 %v279_v57 }
  0x59   :  { %v283_v59 = vor.u32 4788187, %v282_v12 }
  0x5a   :  { %v145_v60 = vmul.f32 %v144_v23, %v140_v25  ;;  %v152_v63 = vmul.f32 %v151_v33, %v140_v25 }
  0x5b   :  { %v284_v44 = vand.u32 2147483647, %v283_v59 }
  0x5c   :  { %v146_v0 = vadd.f32 1.0, %v145_v60  ;;  %v153_v22 = vadd.f32 1.0, %v152_v63 }
  0x5d   :  { %v287_v62 = vmul.f32 %v286_v42, %v284_v44 }
  0x5e   :  { %v154_v1 = vmul.f32 %v153_v22, %v138_v41  ;;  %v162_v5 = vxor.u32 2147483648, %v146_v0 }
  0x5f   :  { %v288_v8 = vxor.u32 2147483648, %v287_v62 }
  0x60   :  { %v159_v43 = vxor.u32 2147483648, %v154_v1  ;;  %v163_v9 = vsel %vm161_vm10, %v162_v5, %v154_v1 }
  0x61   :  { %v289_v10 = vsel %vm168_vm11, %v288_v8, %v287_v62 }
  0x62   :  { %v160_v13 = vsel %vm158_vm12, %v146_v0, %v159_v43  ;;  %v292_v53 = vsel %vm952_vm13, %v790_v3, %v289_v10 }
  0x63   :  { %v164_v6 = vsel %vm157_vm14, %v160_v13, %v163_v9  ;;  %v294_v15 = vmul.f32 %v292_v53, %v292_v53 }
  0x64   :  { %v165_v16 = vsel %vm155_vm15, nan, %v164_v6 }
  0x65   :  { %v295_v17 = vmul.f32 -0.001358992, %v294_v15  ;;  %v302_v19 = vmul.f32 -0.00019511016, %v294_v15  ;;  %v320_v21 = vmul.f32 4.0, %v165_v16 }
  0x67   :  { %v296_v36 = vadd.f32 0.041655596, %v295_v17  ;;  %v303_v18 = vadd.f32 0.008332121, %v302_v19  ;;  %v322_v24 = vmul.f32 %v320_v21, %v165_v16 }
  0x69   :  { %v297_v27 = vmul.f32 %v296_v36, %v294_v15  ;;  %v304_v56 = vmul.f32 %v303_v18, %v294_v15  ;;  %v694_v61 = vadd.f32 -3.0, %v322_v24 }
  0x6b   :  { %v298_v28 = vadd.f32 -0.4999988, %v297_v27  ;;  %v305_v30 = vadd.f32 -0.16666654, %v304_v56  ;;  %v326_v32 = vmul.f32 %v694_v61, %v165_v16 }
  0x6d   :  { %v299_v37 = vmul.f32 %v298_v28, %v294_v15  ;;  %v306_v38 = vmul.f32 %v305_v30, %v294_v15  ;;  %v328_v29 = vmul.f32 -0.75, %v326_v32  ;;  %v332_v39 = vmul.f32 4.0, %v326_v32 }
  0x6f   :  { %v300_v41 = vadd.f32 1.0, %v299_v37  ;;  %v307_v25 = vadd.f32 1.0, %v306_v38  ;;  %v330_v20 = vadd.f32 %v328_v29, %v165_v16  ;;  %v334_v47 = vmul.f32 %v332_v39, %v326_v32 }
  0x71   :  { %v308_v35 = vmul.f32 %v307_v25, %v292_v53  ;;  %v316_v4 = vxor.u32 2147483648, %v300_v41  ;;  %v696_v45 = vadd.f32 -3.0, %v334_v47 }
  0x73   :  { %v313_v46 = vxor.u32 2147483648, %v308_v35  ;;  %v317_v40 = vsel %vm315_vm0, %v316_v4, %v308_v35  ;;  %v338_v48 = vmul.f32 %v696_v45, %v326_v32 }
  0x75   :  { %v314_v49 = vsel %vm312_vm1, %v300_v41, %v313_v46  ;;  %v340_v11 = vmul.f32 0.5625, %v338_v48  ;;  %v344_v50 = vmul.f32 4.0, %v338_v48 }
  0x76   :  { %v318_v31 = vsel %vm311_vm2, %v314_v49, %v317_v40 }
  0x77   :  { %v319_v51 = vsel %vm309_vm3, nan, %v318_v31  ;;  %v342_v52 = vadd.f32 %v340_v11, %v330_v20  ;;  %v346_v54 = vmul.f32 %v344_v50, %v338_v48 }
  0x78   :  { %v321_v55 = vmul.f32 4.0, %v319_v51 }
  0x79   :  { %v698_v57 = vadd.f32 -3.0, %v346_v54 }
  0x7a   :  { %v323_v12 = vmul.f32 %v321_v55, %v319_v51 }
  0x7b   :  { %v350_v23 = vmul.f32 %v698_v57, %v338_v48 }
  0x7c   :  { %v695_v33 = vadd.f32 -3.0, %v323_v12 }
  0x7d   :  { %v352_v58 = vmul.f32 -0.421875, %v350_v23  ;;  %v356_v59 = vmul.f32 4.0, %v350_v23 }
  0x7e   :  { %v327_v42 = vmul.f32 %v695_v33, %v319_v51 }
  0x7f   :  { %v354_v60 = vadd.f32 %v352_v58, %v342_v52  ;;  %v358_v63 = vmul.f32 %v356_v59, %v350_v23 }
  0x80   :  { %v329_v44 = vmul.f32 -0.75, %v327_v42  ;;  %v333_v0 = vmul.f32 4.0, %v327_v42 }
  0x81   :  { %v700_v3 = vadd.f32 -3.0, %v358_v63 }
  0x82   :  { %v331_v22 = vadd.f32 %v329_v44, %v319_v51  ;;  %v335_v62 = vmul.f32 %v333_v0, %v327_v42 }
  0x83   :  { %v362_v1 = vmul.f32 %v700_v3, %v350_v23 }
  0x84   :  { %v697_v5 = vadd.f32 -3.0, %v335_v62 }
  0x85   :  { %v364_v7 = vmul.f32 0.31640625, %v362_v1  ;;  %v368_v8 = vmul.f32 4.0, %v362_v1 }
  0x86   :  { %v339_v43 = vmul.f32 %v697_v5, %v327_v42 }
  0x87   :  { %v366_v9 = vadd.f32 %v364_v7, %v354_v60  ;;  %v370_v10 = vmul.f32 %v368_v8, %v362_v1 }
  0x88   :  { %v341_v13 = vmul.f32 0.5625, %v339_v43  ;;  %v345_v14 = vmul.f32 4.0, %v339_v43 }
  0x89   :  { %v702_v53 = vadd.f32 -3.0, %v370_v10 }
  0x8a   :  { %v343_v6 = vadd.f32 %v341_v13, %v331_v22  ;;  %v347_v15 = vmul.f32 %v345_v14, %v339_v43 }
  0x8b   :  { %v374_v16 = vmul.f32 %v702_v53, %v362_v1 }
  0x8c   :  { %v699_v17 = vadd.f32 -3.0, %v347_v15 }
  0x8d   :  { %v376_v19 = vmul.f32 -0.23730469, %v374_v16  ;;  %v380_v21 = vmul.f32 4.0, %v374_v16 }
  0x8e   :  { %v351_v2 = vmul.f32 %v699_v17, %v339_v43 }
  0x8f   :  { %v378_v36 = vadd.f32 %v376_v19, %v366_v9  ;;  %v382_v18 = vmul.f32 %v380_v21, %v374_v16 }
  0x90   :  { %v353_v24 = vmul.f32 -0.421875, %v351_v2  ;;  %v357_v26 = vmul.f32 4.0, %v351_v2 }
  0x91   :  { %v704_v27 = vadd.f32 -3.0, %v382_v18 }
  0x92   :  { %v355_v56 = vadd.f32 %v353_v24, %v343_v6  ;;  %v359_v61 = vmul.f32 %v357_v26, %v351_v2 }
  0x93   :  { %v386_v28 = vmul.f32 %v704_v27, %v374_v16 }
  0x94   :  { %v701_v30 = vadd.f32 -3.0, %v359_v61 }
  0x95   :  { %v388_v32 = vmul.f32 0.17797852, %v386_v28  ;;  %v392_v34 = vmul.f32 4.0, %v386_v28 }
  0x96   :  { %v363_v37 = vmul.f32 %v701_v30, %v351_v2 }
  0x97   :  { %v390_v38 = vadd.f32 %v388_v32, %v378_v36  ;;  %v394_v29 = vmul.f32 %v392_v34, %v386_v28 }
  0x98   :  { %v365_v39 = vmul.f32 0.31640625, %v363_v37  ;;  %v369_v41 = vmul.f32 4.0, %v363_v37 }
  0x99   :  { %v706_v25 = vadd.f32 -3.0, %v394_v29 }
  0x9a   :  { %v367_v20 = vadd.f32 %v365_v39, %v355_v56  ;;  %v371_v47 = vmul.f32 %v369_v41, %v363_v37 }
  0x9b   :  { %v398_v35 = vmul.f32 %v706_v25, %v386_v28 }
  0x9c   :  { %v703_v4 = vadd.f32 -3.0, %v371_v47 }
  0x9d   :  { %v400_v45 = vmul.f32 -0.13348389, %v398_v35  ;;  %v404_v46 = vmul.f32 4.0, %v398_v35 }
  0x9e   :  { %v375_v40 = vmul.f32 %v703_v4, %v363_v37 }
  0x9f   :  { %v402_v48 = vadd.f32 %v400_v45, %v390_v38  ;;  %v406_v49 = vmul.f32 %v404_v46, %v398_v35 }
  0xa0   :  { %v377_v11 = vmul.f32 -0.23730469, %v375_v40  ;;  %v381_v50 = vmul.f32 4.0, %v375_v40 }
  0xa1   :  { %v708_v31 = vadd.f32 -3.0, %v406_v49 }
  0xa2   :  { %v379_v51 = vadd.f32 %v377_v11, %v367_v20  ;;  %v383_v52 = vmul.f32 %v381_v50, %v375_v40 }
  0xa3   :  { %v410_v54 = vmul.f32 %v708_v31, %v398_v35 }
  0xa4   :  { %v705_v55 = vadd.f32 -3.0, %v383_v52 }
  0xa5   :  { %v412_v57 = vmul.f32 0.100112915, %v410_v54  ;;  %v416_v12 = vmul.f32 4.0, %v410_v54 }
  0xa6   :  { %v387_v23 = vmul.f32 %v705_v55, %v375_v40 }
  0xa7   :  { %v414_v33 = vadd.f32 %v412_v57, %v402_v48  ;;  %v418_v58 = vmul.f32 %v416_v12, %v410_v54 }
  0xa8   :  { %v389_v59 = vmul.f32 0.17797852, %v387_v23  ;;  %v393_v42 = vmul.f32 4.0, %v387_v23 }
  0xa9   :  { %v710_v60 = vadd.f32 -3.0, %v418_v58 }
  0xaa   :  { %v391_v63 = vadd.f32 %v389_v59, %v379_v51  ;;  %v395_v44 = vmul.f32 %v393_v42, %v387_v23 }
  0xab   :  { %v422_v0 = vmul.f32 %v710_v60, %v410_v54 }
  0xac   :  { %v707_v3 = vadd.f32 -3.0, %v395_v44 }
  0xad   :  { %v424_v22 = vmul.f32 -0.07508469, %v422_v0  ;;  %v428_v62 = vmul.f32 4.0, %v422_v0 }
  0xae   :  { %v399_v1 = vmul.f32 %v707_v3, %v387_v23 }
  0xaf   :  { %v426_v5 = vadd.f32 %v424_v22, %v414_v33  ;;  %v430_v7 = vmul.f32 %v428_v62, %v422_v0 }
  0xb0   :  { %v401_v8 = vmul.f32 -0.13348389, %v399_v1  ;;  %v405_v43 = vmul.f32 4.0, %v399_v1 }
  0xb1   :  { %v712_v9 = vadd.f32 -3.0, %v430_v7 }
  0xb2   :  { %v403_v10 = vadd.f32 %v401_v8, %v391_v63  ;;  %v407_v13 = vmul.f32 %v405_v43, %v399_v1 }
  0xb3   :  { %v434_v14 = vmul.f32 %v712_v9, %v422_v0 }
  0xb4   :  { %v709_v53 = vadd.f32 -3.0, %v407_v13 }
  0xb5   :  { %v436_v6 = vmul.f32 0.056313515, %v434_v14  ;;  %v440_v15 = vmul.f32 4.0, %v434_v14 }
  0xb6   :  { %v411_v16 = vmul.f32 %v709_v53, %v399_v1 }
  0xb7   :  { %v438_v17 = vadd.f32 %v436_v6, %v426_v5  ;;  %v442_v19 = vmul.f32 %v440_v15, %v434_v14 }
  0xb8   :  { %v413_v21 = vmul.f32 0.100112915, %v411_v16  ;;  %v417_v2 = vmul.f32 4.0, %v411_v16 }
  0xb9   :  { %v714_v36 = vadd.f32 -3.0, %v442_v19 }
  0xba   :  { %v415_v18 = vadd.f32 %v413_v21, %v403_v10  ;;  %v419_v24 = vmul.f32 %v417_v2, %v411_v16 }
  0xbb   :  { %v446_v26 = vmul.f32 %v714_v36, %v434_v14 }
  0xbc   :  { %v711_v27 = vadd.f32 -3.0, %v419_v24 }
  0xbd   :  { %v448_v56 = vmul.f32 -0.042235136, %v446_v26  ;;  %v452_v61 = vmul.f32 4.0, %v446_v26 }
  0xbe   :  { %v423_v28 = vmul.f32 %v711_v27, %v411_v16 }
  0xbf   :  { %v450_v30 = vadd.f32 %v448_v56, %v438_v17  ;;  %v454_v32 = vmul.f32 %v452_v61, %v446_v26 }
  0xc0   :  { %v425_v34 = vmul.f32 -0.07508469, %v423_v28  ;;  %v429_v37 = vmul.f32 4.0, %v423_v28 }
  0xc1   :  { %v716_v38 = vadd.f32 -3.0, %v454_v32 }
  0xc2   :  { %v427_v29 = vadd.f32 %v425_v34, %v415_v18  ;;  %v431_v39 = vmul.f32 %v429_v37, %v423_v28 }
  0xc3   :  { %v458_v41 = vmul.f32 %v716_v38, %v446_v26 }
  0xc4   :  { %v713_v25 = vadd.f32 -3.0, %v431_v39 }
  0xc5   :  { %v460_v20 = vmul.f32 0.031676352, %v458_v41  ;;  %v464_v47 = vmul.f32 4.0, %v458_v41 }
  0xc6   :  { %v435_v35 = vmul.f32 %v713_v25, %v423_v28 }
  0xc7   :  { %v462_v4 = vadd.f32 %v460_v20, %v450_v30  ;;  %v466_v45 = vmul.f32 %v464_v47, %v458_v41 }
  0xc8   :  { %v437_v46 = vmul.f32 0.056313515, %v435_v35  ;;  %v441_v40 = vmul.f32 4.0, %v435_v35 }
  0xc9   :  { %v718_v48 = vadd.f32 -3.0, %v466_v45 }
  0xca   :  { %v439_v49 = vadd.f32 %v437_v46, %v427_v29  ;;  %v443_v11 = vmul.f32 %v441_v40, %v435_v35 }
  0xcb   :  { %v470_v50 = vmul.f32 %v718_v48, %v458_v41 }
  0xcc   :  { %v715_v31 = vadd.f32 -3.0, %v443_v11 }
  0xcd   :  { %v472_v51 = vmul.f32 -0.023757264, %v470_v50  ;;  %v476_v52 = vmul.f32 4.0, %v470_v50 }
  0xce   :  { %v447_v54 = vmul.f32 %v715_v31, %v435_v35 }
  0xcf   :  { %v474_v55 = vadd.f32 %v472_v51, %v462_v4  ;;  %v478_v57 = vmul.f32 %v476_v52, %v470_v50 }
  0xd0   :  { %v449_v12 = vmul.f32 -0.042235136, %v447_v54  ;;  %v453_v23 = vmul.f32 4.0, %v447_v54 }
  0xd1   :  { %v720_v33 = vadd.f32 -3.0, %v478_v57 }
  0xd2   :  { %v451_v58 = vadd.f32 %v449_v12, %v439_v49  ;;  %v455_v59 = vmul.f32 %v453_v23, %v447_v54 }
  0xd3   :  { %v482_v42 = vmul.f32 %v720_v33, %v470_v50 }
  0xd4   :  { %v717_v60 = vadd.f32 -3.0, %v455_v59 }
  0xd5   :  { %v484_v63 = vmul.f32 0.017817948, %v482_v42  ;;  %v488_v44 = vmul.f32 4.0, %v482_v42 }
  0xd6   :  { %v459_v0 = vmul.f32 %v717_v60, %v447_v54 }
  0xd7   :  { %v486_v3 = vadd.f32 %v484_v63, %v474_v55  ;;  %v490_v22 = vmul.f32 %v488_v44, %v482_v42 }
  0xd8   :  { %v461_v62 = vmul.f32 0.031676352, %v459_v0  ;;  %v465_v1 = vmul.f32 4.0, %v459_v0 }
  0xd9   :  { %v722_v5 = vadd.f32 -3.0, %v490_v22 }
  0xda   :  { %v463_v7 = vadd.f32 %v461_v62, %v451_v58  ;;  %v467_v8 = vmul.f32 %v465_v1, %v459_v0 }
  0xdb   :  { %v494_v43 = vmul.f32 %v722_v5, %v482_v42 }
  0xdc   :  { %v719_v9 = vadd.f32 -3.0, %v467_v8 }
  0xdd   :  { %v496_v10 = vmul.f32 -0.013363461, %v494_v43  ;;  %v500_v13 = vmul.f32 4.0, %v494_v43 }
  0xde   :  { %v471_v14 = vmul.f32 %v719_v9, %v459_v0 }
  0xdf   :  { %v498_v53 = vadd.f32 %v496_v10, %v486_v3  ;;  %v502_v6 = vmul.f32 %v500_v13, %v494_v43 }
  0xe0   :  { %v473_v15 = vmul.f32 -0.023757264, %v471_v14  ;;  %v477_v16 = vmul.f32 4.0, %v471_v14 }
  0xe1   :  { %v724_v17 = vadd.f32 -3.0, %v502_v6 }
  0xe2   :  { %v475_v19 = vadd.f32 %v473_v15, %v463_v7  ;;  %v479_v21 = vmul.f32 %v477_v16, %v471_v14 }
  0xe3   :  { %v506_v2 = vmul.f32 %v724_v17, %v494_v43 }
  0xe4   :  { %v721_v36 = vadd.f32 -3.0, %v479_v21 }
  0xe5   :  { %v508_v18 = vmul.f32 0.0100225955, %v506_v2  ;;  %v512_v24 = vmul.f32 4.0, %v506_v2 }
  0xe6   :  { %v483_v26 = vmul.f32 %v721_v36, %v471_v14 }
  0xe7   :  { %v510_v27 = vadd.f32 %v508_v18, %v498_v53  ;;  %v514_v56 = vmul.f32 %v512_v24, %v506_v2 }
  0xe8   :  { %v485_v61 = vmul.f32 0.017817948, %v483_v26  ;;  %v489_v28 = vmul.f32 4.0, %v483_v26 }
  0xe9   :  { %v726_v30 = vadd.f32 -3.0, %v514_v56 }
  0xea   :  { %v487_v32 = vadd.f32 %v485_v61, %v475_v19  ;;  %v491_v34 = vmul.f32 %v489_v28, %v483_v26 }
  0xeb   :  { %v518_v37 = vmul.f32 %v726_v30, %v506_v2 }
  0xec   :  { %v723_v38 = vadd.f32 -3.0, %v491_v34 }
  0xed   :  { %v520_v29 = vmul.f32 -0.0075169466, %v518_v37  ;;  %v524_v39 = vmul.f32 4.0, %v518_v37 }
  0xee   :  { %v495_v41 = vmul.f32 %v723_v38, %v483_v26 }
  0xef   :  { %v522_v25 = vadd.f32 %v520_v29, %v510_v27  ;;  %v526_v20 = vmul.f32 %v524_v39, %v518_v37 }
  0xf0   :  { %v497_v47 = vmul.f32 -0.013363461, %v495_v41  ;;  %v501_v35 = vmul.f32 4.0, %v495_v41 }
  0xf1   :  { %v728_v4 = vadd.f32 -3.0, %v526_v20 }
  0xf2   :  { %v499_v45 = vadd.f32 %v497_v47, %v487_v32  ;;  %v503_v46 = vmul.f32 %v501_v35, %v495_v41 }
  0xf3   :  { %v530_v40 = vmul.f32 %v728_v4, %v518_v37 }
  0xf4   :  { %v725_v48 = vadd.f32 -3.0, %v503_v46 }
  0xf5   :  { %v532_v49 = vmul.f32 0.00563771, %v530_v40  ;;  %v536_v11 = vmul.f32 4.0, %v530_v40 }
  0xf6   :  { %v507_v50 = vmul.f32 %v725_v48, %v495_v41 }
  0xf7   :  { %v534_v31 = vadd.f32 %v532_v49, %v522_v25  ;;  %v538_v51 = vmul.f32 %v536_v11, %v530_v40 }
  0xf8   :  { %v509_v52 = vmul.f32 0.0100225955, %v507_v50  ;;  %v513_v54 = vmul.f32 4.0, %v507_v50 }
  0xf9   :  { %v730_v55 = vadd.f32 -3.0, %v538_v51 }
  0xfa   :  { %v511_v57 = vadd.f32 %v509_v52, %v499_v45  ;;  %v515_v12 = vmul.f32 %v513_v54, %v507_v50 }
  0xfb   :  { %v542_v23 = vmul.f32 %v730_v55, %v530_v40 }
  0xfc   :  { %v727_v33 = vadd.f32 -3.0, %v515_v12 }
  0xfd   :  { %v548_v58 = vmul.f32 4.0, %v542_v23  ;;  %v544_v41 = vmul.f32 -0.0042282827, %v542_v23 }
  0xfe   :  { %v519_v59 = vmul.f32 %v727_v33, %v507_v50 }
  0xff   :  { %v550_v42 = vmul.f32 %v548_v58, %v542_v23  ;;  %v546_v4 = vadd.f32 %v544_v41, %v534_v31 }
 0x100   :  { %v521_v60 = vmul.f32 -0.0075169466, %v519_v59  ;;  %v525_v63 = vmul.f32 4.0, %v519_v59 }
 0x101   :  { %v732_v44 = vadd.f32 -3.0, %v550_v42 }
 0x102   :  { %v523_v0 = vadd.f32 %v521_v60, %v511_v57  ;;  %v527_v3 = vmul.f32 %v525_v63, %v519_v59 }
 0x103   :  { %v554_v22 = vmul.f32 %v732_v44, %v542_v23 }
 0x104   :  { %v729_v62 = vadd.f32 -3.0, %v527_v3 }
 0x105   :  { %v560_v1 = vmul.f32 4.0, %v554_v22  ;;  %v556_v45 = vmul.f32 0.003171212, %v554_v22 }
 0x106   :  { %v531_v5 = vmul.f32 %v729_v62, %v519_v59 }
 0x107   :  { %v562_v7 = vmul.f32 %v560_v1, %v554_v22  ;;  %v558_v11 = vadd.f32 %v556_v45, %v546_v4 }
 0x108   :  { %v533_v8 = vmul.f32 0.00563771, %v531_v5  ;;  %v537_v43 = vmul.f32 4.0, %v531_v5 }
 0x109   :  { %v734_v9 = vadd.f32 -3.0, %v562_v7 }
 0x10a   :  { %v535_v10 = vadd.f32 %v533_v8, %v523_v0  ;;  %v539_v13 = vmul.f32 %v537_v43, %v531_v5 }
 0x10b   :  { %v566_v14 = vmul.f32 %v734_v9, %v554_v22 }
 0x10c   :  { %v731_v53 = vadd.f32 -3.0, %v539_v13 }
 0x10d   :  { %v572_v6 = vmul.f32 4.0, %v566_v14  ;;  %v568_v50 = vmul.f32 -0.002378409, %v566_v14 }
 0x10e   :  { %v543_v15 = vmul.f32 %v731_v53, %v531_v5 }
 0x10f   :  { %v574_v16 = vmul.f32 %v572_v6, %v566_v14  ;;  %v570_v57 = vadd.f32 %v568_v50, %v558_v11 }
 0x110   :  { %v549_v17 = vmul.f32 4.0, %v543_v15  ;;  %v545_v0 = vmul.f32 -0.0042282827, %v543_v15 }
 0x111   :  { %v736_v19 = vadd.f32 -3.0, %v574_v16  ;;  %v763_v16 = vld [vmem:[%s981_s0] sm:$0xff] }
 0x112   :  { %v551_v21 = vmul.f32 %v549_v17, %v543_v15  ;;  %v547_v8 = vadd.f32 %v545_v0, %v535_v10  ;;  %v668_v17 = vand.u32 2147483647, %v763_v16 }
 0x113   :  { %v578_v2 = vmul.f32 %v736_v19, %v566_v14 }
 0x114   :  { %v733_v36 = vadd.f32 -3.0, %v551_v21  ;;  %v670_v10 = vmul.f32 -0.75, %v668_v17 }
 0x115   :  { %v584_v18 = vmul.f32 4.0, %v578_v2  ;;  %v580_v12 = vmul.f32 0.0017838067, %v578_v2 }
 0x116   :  { %v555_v24 = vmul.f32 %v733_v36, %v543_v15 }
 0x117   :  { %v586_v26 = vmul.f32 %v584_v18, %v578_v2  ;;  %v582_v42 = vadd.f32 %v580_v12, %v570_v57 }
 0x118   :  { %v561_v27 = vmul.f32 4.0, %v555_v24  ;;  %v557_v43 = vmul.f32 0.003171212, %v555_v24 }
 0x119   :  { %v738_v56 = vadd.f32 -3.0, %v586_v26 }
 0x11a   :  { %v563_v61 = vmul.f32 %v561_v27, %v555_v24  ;;  %v559_v15 = vadd.f32 %v557_v43, %v547_v8 }
 0x11b   :  { %v590_v28 = vmul.f32 %v738_v56, %v578_v2 }
 0x11c   :  { %v735_v30 = vadd.f32 -3.0, %v563_v61 }
 0x11d   :  { %v596_v32 = vmul.f32 4.0, %v590_v28  ;;  %v592_v60 = vmul.f32 -0.001337855, %v590_v28 }
 0x11e   :  { %v567_v34 = vmul.f32 %v735_v30, %v555_v24 }
 0x11f   :  { %v598_v37 = vmul.f32 %v596_v32, %v590_v28  ;;  %v594_v22 = vadd.f32 %v592_v60, %v582_v42 }
 0x120   :  { %v573_v38 = vmul.f32 4.0, %v567_v34  ;;  %v569_v21 = vmul.f32 -0.002378409, %v567_v34 }
 0x121   :  { %v740_v29 = vadd.f32 -3.0, %v598_v37 }
 0x122   :  { %v575_v39 = vmul.f32 %v573_v38, %v567_v34  ;;  %v571_v56 = vadd.f32 %v569_v21, %v559_v15 }
 0x123   :  { %v602_v25 = vmul.f32 %v740_v29, %v590_v28  ;;  %v672_v29 = vmul.f32 1.442695, %v670_v10 }
 0x124   :  { %v737_v20 = vadd.f32 -3.0, %v575_v39 }
 0x125   :  { %v608_v47 = vmul.f32 4.0, %v602_v25  ;;  %v604_v62 = vmul.f32 0.0010033912, %v602_v25  ;;  %759 = vpow2.f32 %v672_v29 }
 0x126   :  { %v579_v35 = vmul.f32 %v737_v20, %v567_v34 }
 0x127   :  { %v610_v46 = vmul.f32 %v608_v47, %v602_v25  ;;  %v606_v13 = vadd.f32 %v604_v62, %v594_v22 }
 0x128   :  { %v585_v40 = vmul.f32 4.0, %v579_v35  ;;  %v581_v61 = vmul.f32 0.0017838067, %v579_v35 }
 0x129   :  { %v742_v48 = vadd.f32 -3.0, %v610_v46 }
 0x12a   :  { %v587_v49 = vmul.f32 %v585_v40, %v579_v35  ;;  %v583_v41 = vadd.f32 %v581_v61, %v571_v56 }
 0x12b   :  { %v614_v51 = vmul.f32 %v742_v48, %v602_v25 }
 0x12c   :  { %v739_v52 = vadd.f32 -3.0, %v587_v49 }
 0x12d   :  { %v620_v54 = vmul.f32 4.0, %v614_v51  ;;  %v616_v14 = vmul.f32 -0.00075254345, %v614_v51 }
 0x12e   :  { %v591_v55 = vmul.f32 %v739_v52, %v579_v35  ;;  %v760_v52 = vpop.eup %759 }
 0x12f   :  { %v622_v33 = vmul.f32 %v620_v54, %v614_v51  ;;  %v618_v36 = vadd.f32 %v616_v14, %v606_v13 }
 0x130   :  { %v597_v23 = vmul.f32 4.0, %v591_v55  ;;  %v593_v25 = vmul.f32 -0.001337855, %v591_v55 }
 0x131   :  { %v744_v58 = vadd.f32 -3.0, %v622_v33 }
 0x132   :  { %v599_v59 = vmul.f32 %v597_v23, %v591_v55  ;;  %v595_v40 = vadd.f32 %v593_v25, %v583_v41 }
 0x133   :  { %v626_v31 = vmul.f32 %v744_v58, %v614_v51  ;;  %v678_v58 = vmax.f32 %v763_v16, 0.0 }
 0x134   :  { %v741_v63 = vadd.f32 -3.0, %v599_v59 }
 0x135   :  { %v632_v44 = vmul.f32 4.0, %v626_v31  ;;  %v628_v18 = vmul.f32 0.0005644076, %v626_v31 }
 0x136   :  { %v603_v3 = vmul.f32 %v741_v63, %v591_v55  ;;  %v764_v55 = vld [vmem:[%s981_s0 + $0x8] sm:$0xff] }
 0x137   :  { %v634_v1 = vmul.f32 %v632_v44, %v626_v31  ;;  %v630_v30 = vadd.f32 %v628_v18, %v618_v36  ;;  %v669_v23 = vand.u32 2147483647, %v764_v55 }
 0x138   :  { %v609_v5 = vmul.f32 4.0, %v603_v3  ;;  %v605_v48 = vmul.f32 0.0010033912, %v603_v3 }
 0x139   :  { %v746_v7 = vadd.f32 -3.0, %v634_v1  ;;  %v671_v44 = vmul.f32 -0.75, %v669_v23 }
 0x13a   :  { %v611_v9 = vmul.f32 %v609_v5, %v603_v3  ;;  %v607_v54 = vadd.f32 %v605_v48, %v595_v40 }
 0x13b   :  { %v638_v53 = vmul.f32 %v746_v7, %v626_v31  ;;  %v674_v5 = vmul.f32 1.442695, %v671_v44 }
 0x13c   :  { %v743_v6 = vadd.f32 -3.0, %v611_v9 }
 0x13d   :  { %v644_v19 = vmul.f32 4.0, %v638_v53  ;;  %v640_v32 = vmul.f32 -0.0004233057, %v638_v53  ;;  %761 = vpow2.f32 %v674_v5 }
 0x13e   :  { %v615_v2 = vmul.f32 %v743_v6, %v603_v3 }
 0x13f   :  { %v646_v26 = vmul.f32 %v644_v19, %v638_v53  ;;  %v642_v34 = vadd.f32 %v640_v32, %v630_v30  ;;  %v679_v19 = vmax.f32 %v764_v55, 0.0 }
 0x140   :  { %v621_v27 = vmul.f32 4.0, %v615_v2  ;;  %v617_v57 = vmul.f32 -0.00075254345, %v615_v2 }
 0x141   :  { %v748_v24 = vadd.f32 -3.0, %v646_v26 }
 0x142   :  { %v623_v28 = vmul.f32 %v621_v27, %v615_v2  ;;  %v619_v60 = vadd.f32 %v617_v57, %v607_v54 }
 0x143   :  { %v650_v37 = vmul.f32 %v748_v24, %v638_v53  ;;  %v762_v16 = vpop.eup %761 }
 0x144   :  { %v745_v38 = vadd.f32 -3.0, %v623_v28 }
 0x145   :  { %v656_v39 = vmul.f32 4.0, %v650_v37  ;;  %v652_v47 = vmul.f32 0.00031747928, %v650_v37 }
 0x146   :  { %v627_v20 = vmul.f32 %v745_v38, %v615_v2 }
 0x147   :  { %v658_v4 = vmul.f32 %v656_v39, %v650_v37  ;;  %v654_v35 = vadd.f32 %v652_v47, %v642_v34 }
 0x148   :  { %v633_v45 = vmul.f32 4.0, %v627_v20  ;;  %v629_v31 = vmul.f32 0.0005644076, %v627_v20 }
 0x149   :  { %v750_v46 = vadd.f32 -3.0, %v658_v4 }
 0x14a   :  { %v635_v49 = vmul.f32 %v633_v45, %v627_v20  ;;  %v631_v22 = vadd.f32 %v629_v31, %v619_v60 }
 0x14b   :  { %v662_v11 = vmul.f32 %v750_v46, %v650_v37 }
 0x14c   :  { %v747_v50 = vadd.f32 -3.0, %v635_v49 }
 0x14d   :  { %v664_v51 = vmul.f32 -0.00023810945, %v662_v11 }
 0x14e   :  { %v639_v12 = vmul.f32 %v747_v50, %v627_v20 }
 0x14f   :  { %v666_v33 = vadd.f32 %v664_v51, %v654_v35 }
 0x150   :  { %v645_v59 = vmul.f32 4.0, %v639_v12  ;;  %v641_v62 = vmul.f32 -0.0004233057, %v639_v12 }
 0x151   :  { %v676_v42 = vmul.f32 %v760_v52, %v666_v33 }
 0x152   :  { %v647_v63 = vmul.f32 %v645_v59, %v639_v12  ;;  %v643_v8 = vadd.f32 %v641_v62, %v631_v22 }
 0x153   :  { %v680_v0 = vadd.f32 %v678_v58, %v676_v42 }
 0x154   :  { %v749_v3 = vadd.f32 -3.0, %v647_v63 }
 0x155   :  { %682 = vst [vmem:[%s982_s1] sm:$0xff] %v680_v0 }
 0x156   :  { %v651_v1 = vmul.f32 %v749_v3, %v639_v12 }
 0x158   :  { %v657_v7 = vmul.f32 4.0, %v651_v1  ;;  %v653_v43 = vmul.f32 0.00031747928, %v651_v1 }
 0x15a   :  { %v659_v9 = vmul.f32 %v657_v7, %v651_v1  ;;  %v655_v14 = vadd.f32 %v653_v43, %v643_v8 }
 0x15c   :  { %v751_v13 = vadd.f32 -3.0, %v659_v9 }
 0x15e   :  { %v663_v53 = vmul.f32 %v751_v13, %v651_v1 }
 0x160   :  { %v665_v6 = vmul.f32 -0.00023810945, %v663_v53 }
 0x162   :  { %v667_v17 = vadd.f32 %v665_v6, %v655_v14 }
 0x164   :  { %v677_v15 = vmul.f32 %v762_v16, %v667_v17 }
 0x166   :  { %v681_v21 = vadd.f32 %v679_v19, %v677_v15 }
 0x168   :  { %683 = vst [vmem:[%s982_s1 + $0x8] sm:$0xff] %v681_v21 }

</bundles_post_ra>
